<compile_context>
chip_gen: v5e
topology: v5e:2x2
jax: 0.10.0
libtpu: 0.0.40
codegen_flags: <defaults>
</compile_context>

<pallas_src>
import math
import numpy as np

import jax
import jax.numpy as jnp
from jax import lax
from jax.experimental import pallas as pl
from jax.experimental.pallas import tpu as pltpu  # noqa: F401  (TPU backend)

# ----------------------- small Llama-like config ------------------------------
HIDDEN       = 32
NUM_HEADS    = 4
NUM_KV_HEADS = 2
HEAD_DIM     = HIDDEN // NUM_HEADS            # 8
N_REP        = NUM_HEADS // NUM_KV_HEADS      # 2 (GQA repeat factor)
ROPE_THETA   = 10000.0
BATCH        = 2
SEQ          = 8
DTYPE        = jnp.float32

D         = HEAD_DIM
NH        = NUM_HEADS
BS        = BATCH * SEQ                       # 16 (rows of x / output)
HS        = NH * BS                           # 64 head-stacked rows (h, b, s)
OUT_LANES = ((HIDDEN + 127) // 128) * 128     # 128: lane-dense output slab
NEG       = float(np.finfo(np.float32).min)

SEQ_SHIFT = SEQ.bit_length() - 1              # log2(SEQ) for the in-kernel mask
assert (1 << SEQ_SHIFT) == SEQ, "in-kernel mask assumes SEQ is a power of two"


# ------------------------------ fused kernel ----------------------------------
def _fused_attn_kernel(x_ref, wqkv_ref, rope_ref, wo_ref, o_ref):
    f32 = jnp.float32

    # ---- fused q/k/v projection: ONE lane-dense matmul ----------------------
    # Weight columns are per-head blocks [q_h | k_h | v_h] with repeat_kv and
    # the 1/sqrt(D) attention scale already folded in (host-side, hoisted).
    x = x_ref[...].astype(f32)                                      # (BS, H)
    qkv = jnp.dot(x, wqkv_ref[...], preferred_element_type=f32)     # (BS, NH*3D)

    # ---- stack heads into sublanes ONCE: rows ordered (head, batch, seq) ----
    hkv = jnp.concatenate(
        [qkv[:, h * 3 * D:(h + 1) * 3 * D] for h in range(NH)], axis=0)  # (HS, 3D)
    q = hkv[:, 0:D]                                                  # (HS, D)
    k = hkv[:, D:2 * D]                                              # (HS, D)
    v = hkv[:, 2 * D:3 * D]                                          # (HS, D)

    # ---- RoPE: rotate_half == swap the two D/2 halves ----------------------
    # The -1 sign lives in the sin table; cos/sin are shared by q and k.
    rope = rope_ref[...]                                             # (HS, 2D)
    cos, sinm = rope[:, :D], rope[:, D:]
    q = q * cos + jnp.concatenate([q[:, D // 2:], q[:, :D // 2]], axis=1) * sinm
    k = k * cos + jnp.concatenate([k[:, D // 2:], k[:, :D // 2]], axis=1) * sinm

    # ---- ONE score matmul over all (batch, head) blocks ---------------------
    # scores[r, c] with r, c indexing the stacked (head, batch, seq) rows.
    s = lax.dot_general(q, k, (((1,), (1,)), ((), ())),
                        preferred_element_type=f32)                  # (HS, HS)

    # (batch,head)-block-diagonal + causal mask generated in-kernel (no DMA):
    # allowed iff same (head,batch) block AND key position <= query position.
    r = lax.broadcasted_iota(jnp.int32, (HS, HS), 0)
    c = lax.broadcasted_iota(jnp.int32, (HS, HS), 1)
    ok = (c <= r) & ((r >> SEQ_SHIFT) == (c >> SEQ_SHIFT))
    s = jnp.where(ok, s, NEG)

    # ---- ONE f32 softmax over the whole score block (exact divide) ----------
    s = s - jnp.max(s, axis=-1, keepdims=True)
    p = jnp.exp(s)
    p = p / jnp.sum(p, axis=-1, keepdims=True)

    # ---- ONE PV matmul; rows outside each block contribute exactly 0 --------
    o_hm = jnp.dot(p, v, preferred_element_type=f32)                 # (HS, D)

    # ---- head-stacked -> (BS, NH*D), o-projection, lane-dense store ---------
    attn = jnp.concatenate(
        [o_hm[h * BS:(h + 1) * BS, :] for h in range(NH)], axis=1)   # (BS, NH*D)
    o_ref[...] = jnp.dot(attn, wo_ref[...],
                         preferred_element_type=f32).astype(o_ref.dtype)


# ------------------------------ host-side glue ---------------------------------
def rope_cos_sin(seq_len, head_dim, theta):
    inv_freq = 1.0 / (theta ** (jnp.arange(0, head_dim, 2, dtype=jnp.float32) / head_dim))
    pos = jnp.arange(seq_len, dtype=jnp.float32)
    freqs = pos[:, None] * inv_freq[None, :]          # (S, D/2)
    emb = jnp.concatenate([freqs, freqs], axis=-1)    # (S, D)
    return jnp.cos(emb), jnp.sin(emb)


def prepare_params(params):
    """Hoisted once at init (perf item): fused/padded weights + RoPE tables.

    Returns ready-to-DMA arrays so the jitted forward contains only the
    pallas_call (plus a trivial output slice/reshape).
    """
    wq, wk, wv, wo = params["wq_t"], params["wk_t"], params["wv_t"], params["wo_t"]
    scale = 1.0 / math.sqrt(HEAD_DIM)

    # per-head column blocks [scale*Wq_h | Wk_{h//N_REP} | Wv_{h//N_REP}]:
    # GQA repeat_kv and the attention scale are baked into the weight.
    blocks = []
    for h in range(NUM_HEADS):
        g = h // N_REP
        blocks.append(jnp.concatenate(
            [scale * wq[:, h * D:(h + 1) * D],
             wk[:, g * D:(g + 1) * D],
             wv[:, g * D:(g + 1) * D]], axis=1))
    w_fused = jnp.concatenate(blocks, axis=1).astype(DTYPE)          # (H, NH*3D)

    # one shared RoPE slab for the (head, batch, seq)-stacked layout:
    # [cos | sign*sin] with sign = (-1,...,-1, +1,...,+1) over the head dim.
    cos, sin = rope_cos_sin(SEQ, HEAD_DIM, ROPE_THETA)               # (S, D)
    sign = jnp.concatenate([-jnp.ones((D // 2,), jnp.float32),
                            jnp.ones((D // 2,), jnp.float32)])
    rope = jnp.concatenate([cos, sin * sign[None, :]], axis=1)       # (S, 2D)
    rope = jnp.tile(rope, (BATCH * NUM_HEADS, 1)).astype(DTYPE)      # (HS, 2D)

    # o-projection weight zero-padded to 128 output lanes -> unmasked stores.
    wo_pad = jnp.zeros((NUM_HEADS * D, OUT_LANES), DTYPE).at[:, :HIDDEN].set(wo)

    return {"w_fused": w_fused, "rope": rope, "wo_pad": wo_pad}


def llama_attention_forward(hidden_states, prepared):
    """hidden_states (B, S, H) -> (B, S, H).  Causal mask generated in-kernel."""
    B, S, H = hidden_states.shape
    bs = B * S
    x2d = hidden_states.reshape(bs, H)

    out = pl.pallas_call(
        _fused_attn_kernel,
        out_shape=jax.ShapeDtypeStruct((bs, OUT_LANES), hidden_states.dtype),
        in_specs=[
            pl.BlockSpec((bs, H), lambda: (0, 0)),
            pl.BlockSpec(prepared["w_fused"].shape, lambda: (0, 0)),
            pl.BlockSpec(prepared["rope"].shape, lambda: (0, 0)),
            pl.BlockSpec(prepared["wo_pad"].shape, lambda: (0, 0)),
        ],
        out_specs=pl.BlockSpec((bs, OUT_LANES), lambda: (0, 0)),
        # Gridless: at this size everything is VMEM-resident and the kernel is
        # launch/DMA-latency bound, so a single invocation is optimal.
        # TODO(synk): at real sizes add a parallel batch/q-chunk grid axis
        # (v7x megacore) + flash kv tiling -- see header TODO.
    )(x2d, prepared["w_fused"], prepared["rope"], prepared["wo_pad"])

    return out[:, :H].reshape(B, S, H)


# ------------------------------ JAX reference ----------------------------------
def reference_forward(hidden_states, params, attention_mask):
    B, S, H = hidden_states.shape
    q = (hidden_states @ params["wq_t"]).reshape(B, S, NUM_HEADS, HEAD_DIM)
    k = (hidden_states @ params["wk_t"]).reshape(B, S, NUM_KV_HEADS, HEAD_DIM)
    v = (hidden_states @ params["wv_t"]).reshape(B, S, NUM_KV_HEADS, HEAD_DIM)
    q = q.transpose(0, 2, 1, 3)
    k = k.transpose(0, 2, 1, 3)
    v = v.transpose(0, 2, 1, 3)

    cos, sin = rope_cos_sin(S, HEAD_DIM, ROPE_THETA)

    def rot_half(x):
        return jnp.concatenate([-x[..., HEAD_DIM // 2:], x[..., :HEAD_DIM // 2]], -1)

    q = q * cos + rot_half(q) * sin
    k = k * cos + rot_half(k) * sin

    k = jnp.repeat(k, N_REP, axis=1)
    v = jnp.repeat(v, N_REP, axis=1)

    s = jnp.einsum("bhqd,bhkd->bhqk", q, k) / math.sqrt(HEAD_DIM)
    s = s + attention_mask
    p = jax.nn.softmax(s.astype(jnp.float32), axis=-1).astype(q.dtype)
    o = jnp.einsum("bhqk,bhkd->bhqd", p, v)
    o = o.transpose(0, 2, 1, 3).reshape(B, S, H)
    return o @ params["wo_t"]


# ------------------------------------ main --------------------------------------
if __name__ == "__main__":
    key = jax.random.PRNGKey(0)
    kx, kq, kk, kv, ko = jax.random.split(key, 5)

    hidden_states = jax.random.normal(kx, (BATCH, SEQ, HIDDEN), dtype=DTYPE)

    # torch Linear weights are (out, in); we store them transposed (in, out)
    # so the projection is x @ W.T.  attention_bias=False -> no bias terms.
    params = {
        "wq_t": (0.02 * jax.random.normal(kq, (HIDDEN, NUM_HEADS * HEAD_DIM))).astype(DTYPE),
        "wk_t": (0.02 * jax.random.normal(kk, (HIDDEN, NUM_KV_HEADS * HEAD_DIM))).astype(DTYPE),
        "wv_t": (0.02 * jax.random.normal(kv, (HIDDEN, NUM_KV_HEADS * HEAD_DIM))).astype(DTYPE),
        "wo_t": (0.02 * jax.random.normal(ko, (NUM_HEADS * HEAD_DIM, HIDDEN))).astype(DTYPE),
    }

    # One-time prep (weight fusion, scale folding, RoPE tables, wo padding).
    prepared = prepare_params(params)

    fwd = jax.jit(llama_attention_forward)
    out = jax.block_until_ready(fwd(hidden_states, prepared))

    # reference uses the explicit causal additive mask the HF forward expects.
    i = jnp.arange(SEQ)[:, None]
    j = jnp.arange(SEQ)[None, :]
    causal = jnp.where(j <= i, 0.0, jnp.finfo(jnp.float32).min).astype(DTYPE)
    attention_mask = jnp.broadcast_to(causal, (BATCH, 1, SEQ, SEQ))
    ref = reference_forward(hidden_states, params, attention_mask)

    assert out.shape == (BATCH, SEQ, HIDDEN)
    err = float(jnp.max(jnp.abs(out - ref)))
    assert err < 1e-5, f"max abs err {err}"
    print("KERNEL_OK")
</pallas_src>

<mosaic_0001>
module attributes {stable_mosaic.version = 11 : i64} {
  func.func @_fused_attn_kernel(%arg0: memref<16x32xf32, #tpu.memory_space<vmem>>, %arg1: memref<32x96xf32, #tpu.memory_space<vmem>>, %arg2: memref<64x16xf32, #tpu.memory_space<vmem>>, %arg3: memref<32x128xf32, #tpu.memory_space<vmem>>, %arg4: memref<16x128xf32, #tpu.memory_space<vmem>>) attributes {dimension_semantics = [], scalar_prefetch = 0 : i64, scratch_operands = 0 : i64, tpu.core_type = #tpu.core_type<tc>} {
    %c0 = arith.constant 0 : index
    %c0_0 = arith.constant 0 : index
    %0 = vector.load %arg0[%c0, %c0_0] : memref<16x32xf32, #tpu.memory_space<vmem>>, vector<16x32xf32>
    %c0_1 = arith.constant 0 : index
    %c0_2 = arith.constant 0 : index
    %1 = vector.load %arg1[%c0_1, %c0_2] : memref<32x96xf32, #tpu.memory_space<vmem>>, vector<32x96xf32>
    %cst = arith.constant dense<0.000000e+00> : vector<16x96xf32>
    %2 = tpu.matmul %0, %1, %cst {dimension_numbers = #tpu.dot_dimension_numbers<[1], [0], [0], [1], [0, 0, 1, 1], [], []>} : vector<16x32xf32>, vector<32x96xf32>, vector<16x96xf32> -> vector<16x96xf32>
    %3 = vector.extract_strided_slice %2 {offsets = [0, 0], sizes = [16, 24], strides = [1, 1]} : vector<16x96xf32> to vector<16x24xf32>
    %4 = vector.extract_strided_slice %2 {offsets = [0, 24], sizes = [16, 24], strides = [1, 1]} : vector<16x96xf32> to vector<16x24xf32>
    %5 = vector.extract_strided_slice %2 {offsets = [0, 48], sizes = [16, 24], strides = [1, 1]} : vector<16x96xf32> to vector<16x24xf32>
    %6 = vector.extract_strided_slice %2 {offsets = [0, 72], sizes = [16, 24], strides = [1, 1]} : vector<16x96xf32> to vector<16x24xf32>
    %7 = tpu.concatenate %3, %4, %5, %6 in 0 : vector<16x24xf32>, vector<16x24xf32>, vector<16x24xf32>, vector<16x24xf32> -> vector<64x24xf32>
    %8 = vector.extract_strided_slice %7 {offsets = [0, 0], sizes = [64, 8], strides = [1, 1]} : vector<64x24xf32> to vector<64x8xf32>
    %9 = vector.extract_strided_slice %7 {offsets = [0, 8], sizes = [64, 8], strides = [1, 1]} : vector<64x24xf32> to vector<64x8xf32>
    %10 = vector.extract_strided_slice %7 {offsets = [0, 16], sizes = [64, 8], strides = [1, 1]} : vector<64x24xf32> to vector<64x8xf32>
    %c0_3 = arith.constant 0 : index
    %c0_4 = arith.constant 0 : index
    %11 = vector.load %arg2[%c0_3, %c0_4] : memref<64x16xf32, #tpu.memory_space<vmem>>, vector<64x16xf32>
    %12 = vector.extract_strided_slice %11 {offsets = [0, 0], sizes = [64, 8], strides = [1, 1]} : vector<64x16xf32> to vector<64x8xf32>
    %13 = vector.extract_strided_slice %11 {offsets = [0, 8], sizes = [64, 8], strides = [1, 1]} : vector<64x16xf32> to vector<64x8xf32>
    %14 = arith.mulf %8, %12 : vector<64x8xf32>
    %15 = vector.extract_strided_slice %8 {offsets = [0, 4], sizes = [64, 4], strides = [1, 1]} : vector<64x8xf32> to vector<64x4xf32>
    %16 = vector.extract_strided_slice %8 {offsets = [0, 0], sizes = [64, 4], strides = [1, 1]} : vector<64x8xf32> to vector<64x4xf32>
    %17 = tpu.concatenate %15, %16 in 1 : vector<64x4xf32>, vector<64x4xf32> -> vector<64x8xf32>
    %18 = arith.mulf %17, %13 : vector<64x8xf32>
    %19 = arith.addf %14, %18 : vector<64x8xf32>
    %20 = arith.mulf %9, %12 : vector<64x8xf32>
    %21 = vector.extract_strided_slice %9 {offsets = [0, 4], sizes = [64, 4], strides = [1, 1]} : vector<64x8xf32> to vector<64x4xf32>
    %22 = vector.extract_strided_slice %9 {offsets = [0, 0], sizes = [64, 4], strides = [1, 1]} : vector<64x8xf32> to vector<64x4xf32>
    %23 = tpu.concatenate %21, %22 in 1 : vector<64x4xf32>, vector<64x4xf32> -> vector<64x8xf32>
    %24 = arith.mulf %23, %13 : vector<64x8xf32>
    %25 = arith.addf %20, %24 : vector<64x8xf32>
    %cst_5 = arith.constant dense<0.000000e+00> : vector<64x64xf32>
    %26 = tpu.matmul %19, %25, %cst_5 {dimension_numbers = #tpu.dot_dimension_numbers<[1], [1], [0], [0], [0, 0, 1, 0], [], []>} : vector<64x8xf32>, vector<64x8xf32>, vector<64x64xf32> -> vector<64x64xf32>
    %27 = tpu.iota {dimensions = array<i32: 0>} : vector<64x64xi32>
    %28 = tpu.iota {dimensions = array<i32: 1>} : vector<64x64xi32>
    %29 = arith.cmpi sle, %28, %27 : vector<64x64xi32>
    %c3_i32 = arith.constant 3 : i32
    %30 = vector.broadcast %c3_i32 : i32 to vector<64x64xi32>
    %31 = arith.shrsi %27, %30 : vector<64x64xi32>
    %c3_i32_6 = arith.constant 3 : i32
    %32 = vector.broadcast %c3_i32_6 : i32 to vector<64x64xi32>
    %33 = arith.shrsi %28, %32 : vector<64x64xi32>
    %34 = arith.cmpi eq, %31, %33 : vector<64x64xi32>
    %35 = arith.andi %29, %34 : vector<64x64xi1>
    %cst_7 = arith.constant -3.40282347E+38 : f32
    %36 = vector.broadcast %cst_7 : f32 to vector<64x64xf32>
    %37 = arith.select %35, %26, %36 : vector<64x64xi1>, vector<64x64xf32>
    %cst_8 = arith.constant dense<0xFF800000> : vector<64xf32>
    %38 = vector.multi_reduction <maximumf>, %37, %cst_8 [1] : vector<64x64xf32> to vector<64xf32>
    %39 = vector.shape_cast %38 : vector<64xf32> to vector<64x1xf32>
    %40 = vector.broadcast %39 : vector<64x1xf32> to vector<64x64xf32>
    %41 = arith.subf %37, %40 : vector<64x64xf32>
    %42 = math.exp %41 : vector<64x64xf32>
    %cst_9 = arith.constant dense<0.000000e+00> : vector<64xf32>
    %43 = vector.multi_reduction <add>, %42, %cst_9 [1] : vector<64x64xf32> to vector<64xf32>
    %44 = vector.shape_cast %43 : vector<64xf32> to vector<64x1xf32>
    %45 = vector.broadcast %44 : vector<64x1xf32> to vector<64x64xf32>
    %46 = arith.divf %42, %45 : vector<64x64xf32>
    %cst_10 = arith.constant dense<0.000000e+00> : vector<64x8xf32>
    %47 = tpu.matmul %46, %10, %cst_10 {dimension_numbers = #tpu.dot_dimension_numbers<[1], [0], [0], [1], [0, 0, 1, 1], [], []>} : vector<64x64xf32>, vector<64x8xf32>, vector<64x8xf32> -> vector<64x8xf32>
    %48 = vector.extract_strided_slice %47 {offsets = [0, 0], sizes = [16, 8], strides = [1, 1]} : vector<64x8xf32> to vector<16x8xf32>
    %49 = vector.extract_strided_slice %47 {offsets = [16, 0], sizes = [16, 8], strides = [1, 1]} : vector<64x8xf32> to vector<16x8xf32>
    %50 = vector.extract_strided_slice %47 {offsets = [32, 0], sizes = [16, 8], strides = [1, 1]} : vector<64x8xf32> to vector<16x8xf32>
    %51 = vector.extract_strided_slice %47 {offsets = [48, 0], sizes = [16, 8], strides = [1, 1]} : vector<64x8xf32> to vector<16x8xf32>
    %52 = tpu.concatenate %48, %49, %50, %51 in 1 : vector<16x8xf32>, vector<16x8xf32>, vector<16x8xf32>, vector<16x8xf32> -> vector<16x32xf32>
    %c0_11 = arith.constant 0 : index
    %c0_12 = arith.constant 0 : index
    %53 = vector.load %arg3[%c0_11, %c0_12] : memref<32x128xf32, #tpu.memory_space<vmem>>, vector<32x128xf32>
    %cst_13 = arith.constant dense<0.000000e+00> : vector<16x128xf32>
    %54 = tpu.matmul %52, %53, %cst_13 {dimension_numbers = #tpu.dot_dimension_numbers<[1], [0], [0], [1], [0, 0, 1, 1], [], []>} : vector<16x32xf32>, vector<32x128xf32>, vector<16x128xf32> -> vector<16x128xf32>
    %c0_14 = arith.constant 0 : index
    %c0_15 = arith.constant 0 : index
    %55 = vector.load %arg4[%c0_14, %c0_15] : memref<16x128xf32, #tpu.memory_space<vmem>>, vector<16x128xf32>
    tpu.vector_store %arg4[%c0_14, %c0_15], %54 {strides = array<i32>} : memref<16x128xf32, #tpu.memory_space<vmem>>, vector<16x128xf32>,
    return
  }
}

</mosaic_0001>

<bundles_post_ra>
// kernel: llama_attention_forward.1
= control target key start
LH: loop header
LB: loop body
LE: loop exit
PB: predicated region body
PF: predicated region fallthrough
CT: control target
= control target key end

     0   :  { %s924_s23 = smov 120   ;;  %vm23_vm0 = vcmask 261120   ;;  %s925_s30 = smov 104   ;;  %vm137_vm1 = vcmask 31744   ;;  %vm330_vm2 = vcmask 64512   ;;  %vm464_vm9 = vcmask 523264   ;;  %s1408_s1 = inlined_call_operand.vmem [shape: f32[32,96], index: 1, kind: input, shape index: {}]   ;;  %s1409_s2 = inlined_call_operand.vmem [shape: f32[64,16], index: 2, kind: input, shape index: {}]   ;;  %s1410_s0 = inlined_call_operand.vmem [shape: f32[16,32], index: 0, kind: input, shape index: {}]   ;;  %s1411_s3 = inlined_call_operand.vmem [shape: f32[32,128], index: 3, kind: input, shape index: {}]   ;;  %s1412_s4 = inlined_call_operand.vmem [shape: f32[16,128], index: 4, kind: output, shape index: {}]  }
   0x1   :  { %v22_v0 = vld [vmem:[%s1408_s1 + $0x18] sm:$0xff]  ;;  %v21_v1 = vld [vmem:[%s1408_s1 + $0x10] sm:$0xff]  ;;  %v20_v2 = vld [vmem:[%s1408_s1 + $0x8] sm:$0xff]  ;;  %s927_s5 = smov 56   ;;  %s928_s7 = smov 124  }
   0x2   :  { %42 = vmatpush.msra.mxu3 %v22_v0  ;;  %v972_v3 = vld [vmem:[%s1409_s2 + $0x38] sm:$0xff]  ;;  %v19_v4 = vld [vmem:[%s1408_s1] sm:$0xff]  ;;  %v18_v6 = vld [vmem:[%s1410_s0 + $0x8] sm:$0xff]  ;;  %s926_s1 = smov 80   ;;  %s929_s20 = smov 8  }
   0x3   :  { %168 = vrot.lane.b32.xlu2 %v972_v3, %s924_s23  ;;  %v17_v5 = vld [vmem:[%s1410_s0] sm:$0xff]  ;;  %v1000_v9 = vld [vmem:[%s1409_s2 + $0x30] sm:$0xff]  ;;  %v1009_v10 = vld [vmem:[%s1409_s2 + $0x28] sm:$0xff]  ;;  %s930_s21 = smov 116   ;;  %s932_s22 = smov 112  }
   0x4   :  { %43 = vmatpush.msra.mxu3 %v21_v1  ;;  %v1016_v11 = vld [vmem:[%s1409_s2 + $0x20] sm:$0xff]  ;;  %v1023_v12 = vld [vmem:[%s1409_s2 + $0x18] sm:$0xff]  ;;  %v1030_v13 = vld [vmem:[%s1409_s2 + $0x10] sm:$0xff]  ;;  %s934_s24 = smov 16  }
   0x5   :  { %v1037_v14 = vld [vmem:[%s1409_s2 + $0x8] sm:$0xff]  ;;  %v1044_v15 = vld [vmem:[%s1409_s2] sm:$0xff]  ;;  %s931_s2 = smov 4  }
   0x6   :  { %44 = vmatpush.msra.mxu3 %v20_v2 }
   0x8   :  { %45 = vmatpush.msra.mxu3 %v19_v4 }
   0x9   :  { %817 = vmatmul.msk.f32.vlgmr.msra.gmra.mxu3 %vm23_vm0, %v17_v5 }
  0x11   :  { %818 = vmatmul.msk.f32.gmra.mxu3 %vm23_vm0, %v18_v6 }
  0x5d   :  { %v1055_v17 = vpop.permute.xlu2 %168 }
  0x8c   :  { %v987_v7 = vpop.f32.mrf.mxu3 }
  0x8d   :  { %55 = vrot.lane.b32.xlu2 %v987_v7, %s925_s30  ;;  %61 = vrot.lane.b32.xlu1 %v987_v7, %s926_s1 }
  0x8e   :  { %67 = vrot.lane.b32.xlu0 %v987_v7, %s927_s5 }
  0x94   :  { %v992_v8 = vpop.f32.mrf.mxu3 }
  0x95   :  { %57 = vrot.lane.b32.xlu2 %v992_v8, %s925_s30  ;;  %63 = vrot.lane.b32.xlu1 %v992_v8, %s926_s1 }
  0x96   :  { %69 = vrot.lane.b32.xlu0 %v992_v8, %s927_s5 }
  0x9d   :  { %166 = vrot.lane.b32.xlu2 %v1000_v9, %s924_s23 }
  0x9e   :  { %91 = vrot.lane.b32.xlu0 %v992_v8, %s928_s7 }
  0xa5   :  { %164 = vrot.lane.b32.xlu2 %v1009_v10, %s924_s23 }
  0xad   :  { %162 = vrot.lane.b32.xlu2 %v1016_v11, %s924_s23 }
  0xb5   :  { %160 = vrot.lane.b32.xlu2 %v1023_v12, %s924_s23 }
  0xbd   :  { %158 = vrot.lane.b32.xlu2 %v1030_v13, %s924_s23 }
  0xc5   :  { %156 = vrot.lane.b32.xlu2 %v1037_v14, %s924_s23 }
  0xcd   :  { %154 = vrot.lane.b32.xlu2 %v1044_v15, %s924_s23 }
  0xd5   :  { %206 = vrot.lane.b32.xlu2 %v1000_v9, %s929_s20 }
  0xe7   :  { %v1062_v19 = vpop.permute.xlu2 %55 }
  0xef   :  { %v1077_v22 = vpop.permute.xlu2 %57 }
  0xf7   :  { %v1094_v24 = vpop.permute.xlu2 %166 }
  0xff   :  { %v1057_v18 = vpop.permute.xlu1 %61  ;;  %v1102_v29 = vpop.permute.xlu2 %164 }
 0x100   :  { %v1050_v16 = vpop.permute.xlu0 %67 }
 0x101   :  { %238 = vrot.lane.b32.xlu1 %v1050_v16, %s930_s21  ;;  %101 = vrot.lane.b32.xlu0 %v1050_v16, %s928_s7 }
 0x107   :  { %v1072_v21 = vpop.permute.xlu1 %63  ;;  %v1108_v34 = vpop.permute.xlu2 %162 }
 0x108   :  { %v1067_v20 = vpop.permute.xlu0 %69 }
 0x109   :  { %234 = vrot.lane.b32.xlu1 %v1057_v18, %s930_s21  ;;  %97 = vrot.lane.b32.xlu0 %v1057_v18, %s928_s7 }
 0x10f   :  { %v1115_v39 = vpop.permute.xlu2 %160 }
 0x110   :  { %v1092_v23 = vpop.permute.xlu0 %91 }
 0x111   :  { %230 = vrot.lane.b32.xlu1 %v1062_v19, %s930_s21  ;;  %93 = vrot.lane.b32.xlu0 %v1062_v19, %s928_s7 }
 0x117   :  { %v1128_v46 = vpop.permute.xlu2 %158 }
 0x119   :  { %240 = vrot.lane.b32.xlu1 %v1067_v20, %s930_s21  ;;  %103 = vrot.lane.b32.xlu0 %v1067_v20, %s928_s7 }
 0x11f   :  { %v1140_v51 = vpop.permute.xlu2 %156 }
 0x121   :  { %236 = vrot.lane.b32.xlu1 %v1072_v21, %s930_s21  ;;  %99 = vrot.lane.b32.xlu0 %v1072_v21, %s928_s7 }
 0x127   :  { %v1154_v59 = vpop.permute.xlu2 %154 }
 0x129   :  { %232 = vrot.lane.b32.xlu1 %v1077_v22, %s930_s21  ;;  %95 = vrot.lane.b32.xlu0 %v1077_v22, %s928_s7 }
 0x12f   :  { %v207_v0 = vpop.permute.xlu2 %206 }
 0x130   :  { %v224_v1 = vmul.f32 %v207_v0, %v1050_v16 }
 0x131   :  { %228 = vrot.lane.b32.xlu1 %v992_v8, %s930_s21  ;;  %89 = vrot.lane.b32.xlu0 %v987_v7, %s928_s7 }
 0x139   :  { %226 = vrot.lane.b32.xlu1 %v987_v7, %s930_s21  ;;  %208 = vrot.lane.b32.xlu0 %v972_v3, %s929_s20 }
 0x141   :  { %204 = vrot.lane.b32.xlu1 %v1009_v10, %s929_s20  ;;  %202 = vrot.lane.b32.xlu0 %v1016_v11, %s929_s20 }
 0x173   :  { %v239_v25 = vpop.permute.xlu1 %238  ;;  %v1096_v26 = vpop.permute.xlu0 %101 }
 0x174   :  { %v256_v27 = vsel %vm137_vm1, %v239_v25, %v1096_v26 }
 0x175   :  { %v264_v28 = vmul.f32 %v256_v27, %v1094_v24 }
 0x177   :  { %286 = vrot.lane.b32.xlu0 %v264_v28, %s929_s20 }
 0x17b   :  { %v235_v30 = vpop.permute.xlu1 %234  ;;  %v1104_v31 = vpop.permute.xlu0 %97 }
 0x17c   :  { %v254_v40 = vsel %vm137_vm1, %v235_v30, %v1104_v31 }
 0x17d   :  { %v262_v44 = vmul.f32 %v254_v40, %v1108_v34 }
 0x183   :  { %v231_v32 = vpop.permute.xlu1 %230  ;;  %v1106_v33 = vpop.permute.xlu0 %93 }
 0x184   :  { %v252_v52 = vsel %vm137_vm1, %v231_v32, %v1106_v33 }
 0x185   :  { %v260_v55 = vmul.f32 %v252_v52, %v1128_v46 }
 0x18b   :  { %v241_v35 = vpop.permute.xlu1 %240  ;;  %v1110_v36 = vpop.permute.xlu0 %103 }
 0x18c   :  { %v257_v37 = vsel %vm137_vm1, %v241_v35, %v1110_v36 }
 0x18d   :  { %v265_v38 = vmul.f32 %v257_v37, %v1055_v17 }
 0x18f   :  { %288 = vrot.lane.b32.xlu1 %v265_v38, %s929_s20 }
 0x193   :  { %v237_v41 = vpop.permute.xlu1 %236  ;;  %v1120_v42 = vpop.permute.xlu0 %99 }
 0x194   :  { %v255_v43 = vsel %vm137_vm1, %v237_v41, %v1120_v42 }
 0x195   :  { %v263_v45 = vmul.f32 %v255_v43, %v1102_v29 }
 0x197   :  { %282 = vrot.lane.b32.xlu1 %v262_v44, %s929_s20  ;;  %284 = vrot.lane.b32.xlu2 %v263_v45, %s929_s20 }
 0x19b   :  { %v233_v47 = vpop.permute.xlu1 %232  ;;  %v1130_v48 = vpop.permute.xlu0 %95 }
 0x19c   :  { %v253_v49 = vsel %vm137_vm1, %v233_v47, %v1130_v48 }
 0x19d   :  { %v261_v50 = vmul.f32 %v253_v49, %v1115_v39 }
 0x19f   :  { %198 = vrot.lane.b32.xlu1 %v1030_v13, %s929_s20  ;;  %200 = vrot.lane.b32.xlu2 %v1023_v12, %s929_s20 }
 0x1a0   :  { %280 = vrot.lane.b32.xlu0 %v261_v50, %s929_s20 }
 0x1a3   :  { %v229_v53 = vpop.permute.xlu1 %228  ;;  %v1152_v57 = vpop.permute.xlu0 %89 }
 0x1a4   :  { %v251_v54 = vsel %vm137_vm1, %v229_v53, %v1092_v23 }
 0x1a5   :  { %v259_v56 = vmul.f32 %v251_v54, %v1140_v51 }
 0x1a7   :  { %276 = vrot.lane.b32.xlu1 %v259_v56, %s929_s20  ;;  %278 = vrot.lane.b32.xlu2 %v260_v55, %s929_s20 }
 0x1a8   :  { %196 = vrot.lane.b32.xlu0 %v1037_v14, %s929_s20 }
 0x1ab   :  { %v227_v58 = vpop.permute.xlu1 %226  ;;  %v209_v62 = vpop.permute.xlu0 %208 }
 0x1ac   :  { %v250_v60 = vsel %vm137_vm1, %v227_v58, %v1152_v57  ;;  %v225_v28 = vmul.f32 %v209_v62, %v1067_v20 }
 0x1ad   :  { %v258_v61 = vmul.f32 %v250_v60, %v1154_v59 }
 0x1af   :  { %194 = vrot.lane.b32.xlu2 %v1044_v15, %s929_s20 }
 0x1b0   :  { %274 = vrot.lane.b32.xlu0 %v258_v61, %s929_s20 }
 0x1b3   :  { %v203_v63 = vpop.permute.xlu0 %202  ;;  %v205_v5 = vpop.permute.xlu1 %204 }
 0x1b4   :  { %v223_v6 = vmul.f32 %v205_v5, %v1072_v21  ;;  %v222_v35 = vmul.f32 %v203_v63, %v1057_v18 }
 0x1e9   :  { %v287_v2 = vpop.permute.xlu0 %286 }
 0x1ea   :  { %v304_v4 = vadd.f32 %v287_v2, %v224_v1 }
 0x1ec   :  { %326 = vrot.lane.b32.xlu2 %v304_v4, %s924_s23 }
 0x1f1   :  { %v285_v25 = vpop.permute.xlu2 %284 }
 0x1f2   :  { %v303_v27 = vadd.f32 %v285_v25, %v223_v6 }
 0x1f4   :  { %324 = vrot.lane.b32.xlu0 %v303_v27, %s924_s23 }
 0x1f9   :  { %v201_v37 = vpop.permute.xlu2 %200 }
 0x1fa   :  { %v221_v41 = vmul.f32 %v201_v37, %v1077_v22 }
 0x201   :  { %v289_v30 = vpop.permute.xlu1 %288  ;;  %v279_v47 = vpop.permute.xlu2 %278 }
 0x202   :  { %v305_v32 = vadd.f32 %v289_v30, %v225_v28  ;;  %v81_v28 = vmul.f32 %v1044_v15, %v987_v7 }
 0x204   :  { %328 = vrot.lane.b32.xlu1 %v305_v32, %s924_s23 }
 0x209   :  { %v283_v38 = vpop.permute.xlu1 %282  ;;  %v195_v56 = vpop.permute.xlu2 %194 }
 0x20a   :  { %v302_v40 = vadd.f32 %v283_v38, %v222_v35  ;;  %v218_v58 = vmul.f32 %v195_v56, %v987_v7 }
 0x20c   :  { %322 = vrot.lane.b32.xlu1 %v302_v40, %s924_s23 }
 0x211   :  { %v199_v43 = vpop.permute.xlu1 %198 }
 0x212   :  { %v220_v44 = vmul.f32 %v199_v43, %v1062_v19  ;;  %v281_v45 = vpop.permute.xlu0 %280 }
 0x213   :  { %v301_v49 = vadd.f32 %v281_v45, %v221_v41  ;;  %v85_v45 = vmul.f32 %v1016_v11, %v1057_v18 }
 0x214   :  { %v300_v50 = vadd.f32 %v279_v47, %v220_v44 }
 0x215   :  { %320 = vrot.lane.b32.xlu2 %v301_v49, %s924_s23  ;;  %v83_v49 = vmul.f32 %v1030_v13, %v1062_v19 }
 0x216   :  { %318 = vrot.lane.b32.xlu0 %v300_v50, %s924_s23 }
 0x219   :  { %v277_v54 = vpop.permute.xlu1 %276 }
 0x21a   :  { %v197_v52 = vpop.permute.xlu0 %196 }
 0x21b   :  { %v219_v53 = vmul.f32 %v197_v52, %v992_v8 }
 0x21d   :  { %v299_v55 = vadd.f32 %v277_v54, %v219_v53  ;;  %113 = vrot.lane.b32.xlu2 %v987_v7, %s931_s2  ;;  %v84_v53 = vmul.f32 %v1023_v12, %v1077_v22  ;;  %v412_v12 = vlaneseq }
 0x21f   :  { %316 = vrot.lane.b32.xlu1 %v299_v55, %s924_s23 }
 0x222   :  { %v275_v60 = vpop.permute.xlu0 %274 }
 0x223   :  { %v298_v61 = vadd.f32 %v275_v60, %v218_v58  ;;  %v413_v58 = vshrl.u32 %v412_v12, 7  ;;  %v1250_v60 = vand.u32 127, %v412_v12  ;;  %v887_v12 = vpack.i.bf16 %v987_v7, %v992_v8 }
 0x225   :  { %117 = vrot.lane.b32.xlu2 %v1062_v19, %s931_s2  ;;  %314 = vrot.lane.b32.xlu0 %v298_v61, %s924_s23  ;;  %v431_v61 = vshra.s32 %v413_v58, 3  ;;  %vm423_vm6 = vcmp.le.s32.totalorder %v1250_v60, %v413_v58  ;;  %s933_s23 = smov 24  }
 0x227   :  { %115 = vrot.lane.b32.xlu1 %v992_v8, %s931_s2 }
 0x22d   :  { %123 = vrot.lane.b32.xlu2 %v1072_v21, %s931_s2  ;;  %121 = vrot.lane.b32.xlu0 %v1057_v18, %s931_s2 }
 0x22f   :  { %119 = vrot.lane.b32.xlu1 %v1077_v22, %s931_s2 }
 0x235   :  { %125 = vrot.lane.b32.xlu0 %v1050_v16, %s931_s2 }
 0x237   :  { %127 = vrot.lane.b32.xlu1 %v1067_v20, %s931_s2 }
 0x246   :  { %v327_v63 = vpop.permute.xlu2 %326 }
 0x266   :  { %v325_v0 = vpop.permute.xlu0 %324 }
 0x26f   :  { %v321_v2 = vpop.permute.xlu2 %320 }
 0x276   :  { %v329_v62 = vpop.permute.xlu1 %328 }
 0x277   :  { %819 = vmatpush.xpose.msk.msra.mxu0 %vm330_vm2, %v329_v62  ;;  %845 = vmatpush.xpose.msk.msra.mxu1 %vm330_vm2, %v329_v62  ;;  %v114_v5 = vpop.permute.xlu2 %113  ;;  %v1253_v62 = vshra.s32 %v1250_v60, 3 }
 0x278   :  { %v138_v25 = vsel %vm137_vm1, %v1152_v57, %v114_v5 }
 0x279   :  { %v178_v27 = vmul.f32 %v1154_v59, %v138_v25  ;;  %v82_v59 = vmul.f32 %v1037_v14, %v992_v8  ;;  %vm440_vm7 = vcmp.eq.s32.totalorder %v431_v61, %v1253_v62 }
 0x27a   :  { %vm448_vm8 = vmand %vm423_vm6, %vm440_vm7 }
 0x27b   :  { %820 = vmatpush.xpose.msk.msra.mxu0 %vm330_vm2, %v327_v63  ;;  %846 = vmatpush.xpose.msk.msra.mxu1 %vm330_vm2, %v327_v63  ;;  %v186_v37 = vadd.f32 %v178_v27, %v81_v28  ;;  %v417_v63 = vadd.s32 32, %v413_v58 }
 0x27d   :  { %vm427_vm12 = vcmp.le.s32.totalorder %v1250_v60, %v417_v63 }
 0x27e   :  { %v323_v1 = vpop.permute.xlu1 %322 }
 0x27f   :  { %821 = vmatpush.xpose.msk.msra.mxu0 %vm330_vm2, %v325_v0  ;;  %847 = vmatpush.xpose.msk.msra.mxu1 %vm330_vm2, %v325_v0  ;;  %v118_v30 = vpop.permute.xlu2 %117 }
 0x283   :  { %822 = vmatpush.xpose.msk.msra.mxu0 %vm330_vm2, %v323_v1  ;;  %848 = vmatpush.xpose.msk.msra.mxu1 %vm330_vm2, %v323_v1 }
 0x287   :  { %823 = vmatpush.xpose.msk.msra.mxu0 %vm330_vm2, %v321_v2  ;;  %849 = vmatpush.xpose.msk.msra.mxu1 %vm330_vm2, %v321_v2  ;;  %v124_v41 = vpop.permute.xlu2 %123 }
 0x288   :  { %v319_v4 = vpop.permute.xlu0 %318  ;;  %v143_v14 = vsel %vm137_vm1, %v1120_v42, %v124_v41 }
 0x28b   :  { %824 = vmatpush.xpose.msk.msra.mxu0 %vm330_vm2, %v319_v4  ;;  %850 = vmatpush.xpose.msk.msra.mxu1 %vm330_vm2, %v319_v4  ;;  %v435_v4 = vshra.s32 %v417_v63, 3 }
 0x28d   :  { %vm444_vm13 = vcmp.eq.s32.totalorder %v435_v4, %v1253_v62 }
 0x28e   :  { %vm452_vm15 = vmand %vm427_vm12, %vm444_vm13 }
 0x291   :  { %v317_v6 = vpop.permute.xlu1 %316 }
 0x292   :  { %825 = vmatpush.xpose.msk.msra.mxu0 %vm330_vm2, %v317_v6  ;;  %851 = vmatpush.xpose.msk.msra.mxu1 %vm330_vm2, %v317_v6  ;;  %v418_v6 = vadd.s32 40, %v413_v58 }
 0x294   :  { %v436_v28 = vshra.s32 %v418_v6, 3 }
 0x297   :  { %v315_v32 = vpop.permute.xlu0 %314 }
 0x298   :  { %826 = vmatpush.xpose.msk.msra.mxu0 %vm330_vm2, %v315_v32  ;;  %852 = vmatpush.xpose.msk.msra.mxu1 %vm330_vm2, %v315_v32 }
 0x299   :  { %v116_v35 = vpop.permute.xlu1 %115 }
 0x29a   :  { %v139_v57 = vsel %vm137_vm1, %v1092_v23, %v116_v35  ;;  %v140_v23 = vsel %vm137_vm1, %v1106_v33, %v118_v30  ;;  %v86_v33 = vmul.f32 %v1009_v10, %v1072_v21  ;;  %v415_v35 = vadd.s32 16, %v413_v58 }
 0x29b   :  { %827 = vmatmul.msk.f32.vlgmr.msra.gmra.mxu0 %vm330_vm2, %v186_v37  ;;  %v179_v38 = vmul.f32 %v1140_v51, %v139_v57  ;;  %v180_v47 = vmul.f32 %v1128_v46, %v140_v23  ;;  %v416_v57 = vadd.s32 24, %v413_v58 }
 0x29c   :  { %vm425_vm6 = vcmp.le.s32.totalorder %v1250_v60, %v415_v35 }
 0x29d   :  { %v187_v44 = vadd.f32 %v179_v38, %v82_v59  ;;  %v188_v50 = vadd.f32 %v180_v47, %v83_v49  ;;  %v433_v59 = vshra.s32 %v415_v35, 3 }
 0x29f   :  { %v122_v40 = vpop.permute.xlu0 %121  ;;  %vm442_vm7 = vcmp.eq.s32.totalorder %v433_v59, %v1253_v62 }
 0x2a0   :  { %v142_v15 = vsel %vm137_vm1, %v1104_v31, %v122_v40  ;;  %v183_v31 = vmul.f32 %v1102_v29, %v143_v14  ;;  %v434_v40 = vshra.s32 %v416_v57, 3 }
 0x2a1   :  { %v182_v43 = vmul.f32 %v1108_v34, %v142_v15  ;;  %v120_v34 = vpop.permute.xlu1 %119 }
 0x2a2   :  { %v141_v52 = vsel %vm137_vm1, %v1130_v48, %v120_v34  ;;  %v191_v42 = vadd.f32 %v183_v31, %v86_v33  ;;  %v87_v48 = vmul.f32 %v1000_v9, %v1050_v16  ;;  %v419_v9 = vadd.s32 48, %v413_v58 }
 0x2a3   :  { %828 = vmatmul.msk.f32.gmra.mxu0 %vm330_vm2, %v187_v44  ;;  %v190_v51 = vadd.f32 %v182_v43, %v85_v45  ;;  %v181_v29 = vmul.f32 %v1115_v39, %v141_v52  ;;  %v420_v45 = vadd.s32 56, %v413_v58 }
 0x2a4   :  { %vm429_vm3 = vcmp.le.s32.totalorder %v1250_v60, %v419_v9 }
 0x2a5   :  { %831 = vmatmul.msk.f32.vlgmr.msra.gmra.mxu1 %vm330_vm2, %v190_v51  ;;  %v189_v10 = vadd.f32 %v181_v29, %v84_v53  ;;  %v438_v47 = vshra.s32 %v420_v45, 3  ;;  %vm430_vm13 = vcmp.le.s32.totalorder %v1250_v60, %v420_v45 }
 0x2a7   :  { %v126_v11 = vpop.permute.xlu0 %125 }
 0x2a8   :  { %v144_v46 = vsel %vm137_vm1, %v1096_v26, %v126_v11  ;;  %v877_v11 = vpack.i.bf16 %v1057_v18, %v1072_v21 }
 0x2a9   :  { %v184_v13 = vmul.f32 %v1094_v24, %v144_v46  ;;  %v128_v54 = vpop.permute.xlu1 %127  ;;  %v88_v24 = vmul.f32 %v972_v3, %v1067_v20  ;;  %v414_v3 = vadd.s32 8, %v413_v58 }
 0x2aa   :  { %v145_v26 = vsel %vm137_vm1, %v1110_v36, %v128_v54  ;;  %v437_v36 = vshra.s32 %v419_v9, 3  ;;  %vm428_vm1 = vcmp.le.s32.totalorder %v1250_v60, %v418_v6  ;;  %v882_v9 = vpack.i.bf16 %v1062_v19, %v1077_v22 }
 0x2ab   :  { %829 = vmatmul.msk.f32.gmra.mxu0 %vm330_vm2, %v188_v50  ;;  %v192_v55 = vadd.f32 %v184_v13, %v87_v48  ;;  %v185_v39 = vmul.f32 %v1055_v17, %v145_v26  ;;  %v432_v0 = vshra.s32 %v414_v3, 3  ;;  %vm424_vm10 = vcmp.le.s32.totalorder %v1250_v60, %v414_v3 }
 0x2ac   :  { %vm446_vm4 = vcmp.eq.s32.totalorder %v437_v36, %v1253_v62 }
 0x2ad   :  { %832 = vmatmul.msk.f32.gmra.mxu1 %vm330_vm2, %v191_v42  ;;  %v193_v56 = vadd.f32 %v185_v39, %v88_v24  ;;  %vm1257_vm5 = vmand %vm429_vm3, %vm446_vm4  ;;  %vm441_vm11 = vcmp.eq.s32.totalorder %v432_v0, %v1253_v62  ;;  %vm445_vm3 = vcmp.eq.s32.totalorder %v436_v28, %v1253_v62  ;;  %v872_v42 = vpack.i.bf16 %v1050_v16, %v1067_v20 }
 0x2ae   :  { %vm449_vm14 = vmand %vm424_vm10, %vm441_vm11  ;;  %vm443_vm10 = vcmp.eq.s32.totalorder %v434_v40, %v1253_v62 }
 0x2af   :  { %vm453_vm4 = vmand %vm428_vm1, %vm445_vm3 }
 0x2b0   :  { %vm450_vm11 = vmand %vm425_vm6, %vm442_vm7 }
 0x2b3   :  { %830 = vmatmul.msk.f32.gmra.mxu0 %vm330_vm2, %v189_v10 }
 0x2b5   :  { %833 = vmatmul.msk.f32.gmra.mxu1 %vm330_vm2, %v192_v55 }
 0x2bd   :  { %834 = vmatmul.msk.f32.gmra.mxu1 %vm330_vm2, %v193_v56 }
 0x318   :  { %v388_v1 = vpop.f32.mrf.mxu0 }
 0x319   :  { %v1263_v2 = vsel %vm448_vm8, %v388_v1, -3.4028235e+38  ;;  %vm426_vm8 = vcmp.le.s32.totalorder %v1250_v60, %v416_v57 }
 0x31a   :  { %v465_v5 = vsel %vm464_vm9, %v1263_v2, -inf  ;;  %vm451_vm12 = vmand %vm426_vm8, %vm443_vm10 }
 0x31b   :  { %466 = vmax.xlane.f32.xlu2 %v465_v5 }
 0x320   :  { %v391_v25 = vpop.f32.mrf.mxu0 }
 0x321   :  { %v457_v27 = vsel %vm449_vm14, %v391_v25, -3.4028235e+38  ;;  %vm447_vm14 = vcmp.eq.s32.totalorder %v438_v47, %v1253_v62 }
 0x322   :  { %v400_v30 = vpop.f32.mrf.mxu1  ;;  %v468_v32 = vsel %vm464_vm9, %v457_v27, -inf }
 0x323   :  { %v1272_v37 = vsel %vm452_vm15, %v400_v30, -3.4028235e+38  ;;  %469 = vmax.xlane.f32.xlu0 %v468_v32  ;;  %vm455_vm15 = vmand %vm430_vm13, %vm447_vm14 }
 0x324   :  { %v477_v38 = vsel %vm464_vm9, %v1272_v37, -inf }
 0x325   :  { %478 = vmax.xlane.f32.xlu2 %v477_v38 }
 0x328   :  { %v394_v15 = vpop.f32.mrf.mxu0 }
 0x329   :  { %v458_v51 = vsel %vm450_vm11, %v394_v15, -3.4028235e+38 }
 0x32a   :  { %v403_v41 = vpop.f32.mrf.mxu1  ;;  %v471_v49 = vsel %vm464_vm9, %v458_v51, -inf }
 0x32b   :  { %v1280_v43 = vsel %vm453_vm4, %v403_v41, -3.4028235e+38 }
 0x32c   :  { %v480_v44 = vsel %vm464_vm9, %v1280_v43, -inf }
 0x32d   :  { %481 = vmax.xlane.f32.xlu1 %v480_v44 }
 0x330   :  { %v397_v23 = vpop.f32.mrf.mxu0 }
 0x331   :  { %v1286_v14 = vsel %vm451_vm12, %v397_v23, -3.4028235e+38 }
 0x332   :  { %v406_v31 = vpop.f32.mrf.mxu1  ;;  %v474_v34 = vsel %vm464_vm9, %v1286_v14, -inf }
 0x333   :  { %475 = vmax.xlane.f32.xlu2 %v474_v34  ;;  %v462_v18 = vsel %vm1257_vm5, %v406_v31, -3.4028235e+38 }
 0x334   :  { %v483_v21 = vsel %vm464_vm9, %v462_v18, -inf }
 0x335   :  { %472 = vmax.xlane.f32.xlu1 %v471_v49 }
 0x337   :  { %878 = vrot.lane.b32.xlu0 %v877_v11, %s932_s22 }
 0x33a   :  { %v409_v50 = vpop.f32.mrf.mxu1 }
 0x33b   :  { %v463_v33 = vsel %vm455_vm15, %v409_v50, -3.4028235e+38 }
 0x33c   :  { %v486_v52 = vsel %vm464_vm9, %v463_v33, -inf }
 0x33d   :  { %487 = vmax.xlane.f32.xlu2 %v486_v52 }
 0x34e   :  { %873 = vrot.lane.b32.xlu1 %v872_v42, %s932_s22 }
 0x361   :  { %484 = vmax.xlane.f32.xlu0 %v483_v21 }
 0x38e   :  { %v467_v46 = vpop.xlane.xlu2 %466 }
 0x38f   :  { %v489_v29 = vsub.f32 %v1263_v2, %v467_v46 }
 0x391   :  { %v497_v13 = vmul.f32 1.442695, %v489_v29 }
 0x393   :  { %892 = vpow2.f32 %v497_v13 }
 0x396   :  { %v470_v53 = vpop.xlane.xlu0 %469 }
 0x397   :  { %v490_v54 = vsub.f32 %v457_v27, %v470_v53 }
 0x398   :  { %v479_v61 = vpop.xlane.xlu2 %478 }
 0x399   :  { %v1304_v10 = vpop.eup %892  ;;  %v499_v48 = vmul.f32 1.442695, %v490_v54  ;;  %v493_v2 = vsub.f32 %v1272_v37, %v479_v61 }
 0x39a   :  { %v513_v16 = vsel %vm464_vm9, %v1304_v10, 0.0 }
 0x39b   :  { %894 = vpow2.f32 %v499_v48  ;;  %514 = vadd.xlane.f32.xlu0 %v513_v16  ;;  %v505_v27 = vmul.f32 1.442695, %v493_v2 }
 0x3a0   :  { %v482_v20 = vpop.xlane.xlu1 %481 }
 0x3a1   :  { %v1308_v55 = vpop.eup %894  ;;  %v494_v28 = vsub.f32 %v1280_v43, %v482_v20 }
 0x3a2   :  { %v516_v26 = vsel %vm464_vm9, %v1308_v55, 0.0 }
 0x3a3   :  { %517 = vadd.xlane.f32.xlu2 %v516_v26  ;;  %v507_v35 = vmul.f32 1.442695, %v494_v28 }
 0x3a6   :  { %v476_v8 = vpop.xlane.xlu2 %475 }
 0x3a7   :  { %v492_v63 = vsub.f32 %v1286_v14, %v476_v8 }
 0x3a8   :  { %v473_v39 = vpop.xlane.xlu1 %472 }
 0x3a9   :  { %v491_v24 = vsub.f32 %v458_v51, %v473_v39  ;;  %v879_v17 = vpop.permute.xlu0 %878  ;;  %v503_v19 = vmul.f32 1.442695, %v492_v63 }
 0x3aa   :  { %v880_v3 = vunpack.i.l.bf16 %v879_v17  ;;  %v881_v0 = vunpack.i.h.bf16 %v879_v17 }
 0x3ab   :  { %v501_v56 = vmul.f32 1.442695, %v491_v24 }
 0x3ad   :  { %896 = vpow2.f32 %v501_v56 }
 0x3ae   :  { %898 = vpow2.f32 %v503_v19 }
 0x3af   :  { %888 = vrot.lane.b32.xlu0 %v887_v12, %s932_s22 }
 0x3b0   :  { %v488_v22 = vpop.xlane.xlu2 %487 }
 0x3b1   :  { %v496_v1 = vsub.f32 %v463_v33, %v488_v22 }
 0x3b3   :  { %v1315_v58 = vpop.eup %896  ;;  %v511_v4 = vmul.f32 1.442695, %v496_v1 }
 0x3b4   :  { %v519_v60 = vsel %vm464_vm9, %v1315_v58, 0.0  ;;  %v1324_v6 = vpop.eup %898 }
 0x3b5   :  { %520 = vadd.xlane.f32.xlu1 %v519_v60  ;;  %900 = vpow2.f32 %v511_v4  ;;  %v522_v32 = vsel %vm464_vm9, %v1324_v6, 0.0 }
 0x3bb   :  { %883 = vrot.lane.b32.xlu2 %v882_v9, %s932_s22  ;;  %v1329_v57 = vpop.eup %900 }
 0x3bc   :  { %v534_v40 = vsel %vm464_vm9, %v1329_v57, 0.0 }
 0x3c0   :  { %v874_v62 = vpop.permute.xlu1 %873 }
 0x3c1   :  { %v875_v36 = vunpack.i.l.bf16 %v874_v62  ;;  %v876_v7 = vunpack.i.h.bf16 %v874_v62 }
 0x3c3   :  { %713 = vmatpush.msra.mxu2 %v875_v36  ;;  %853 = vmatpush.msrb.mxu3 %v875_v36 }
 0x3c5   :  { %714 = vmatpush.msra.mxu2 %v876_v7  ;;  %854 = vmatpush.msrb.mxu3 %v876_v7 }
 0x3c7   :  { %715 = vmatpush.msra.mxu2 %v880_v3  ;;  %855 = vmatpush.msrb.mxu3 %v880_v3 }
 0x3c9   :  { %716 = vmatpush.msra.mxu2 %v881_v0  ;;  %856 = vmatpush.msrb.mxu3 %v881_v0 }
 0x3d4   :  { %v485_v5 = vpop.xlane.xlu0 %484 }
 0x3d5   :  { %v495_v25 = vsub.f32 %v462_v18, %v485_v5 }
 0x3d7   :  { %v509_v30 = vmul.f32 1.442695, %v495_v25 }
 0x3d9   :  { %902 = vpow2.f32 %v509_v30  ;;  %523 = vadd.xlane.f32.xlu0 %v522_v32 }
 0x3da   :  { %904 = vpow2.f32 %v505_v27 }
 0x3db   :  { %906 = vpow2.f32 %v507_v35 }
 0x3df   :  { %v1331_v37 = vpop.eup %902 }
 0x3e0   :  { %v1333_v38 = vpop.eup %904  ;;  %v531_v59 = vsel %vm464_vm9, %v1331_v37, 0.0 }
 0x3e1   :  { %532 = vadd.xlane.f32.xlu1 %v531_v59  ;;  %535 = vadd.xlane.f32.xlu0 %v534_v40  ;;  %v525_v15 = vsel %vm464_vm9, %v1333_v38, 0.0  ;;  %v1341_v41 = vpop.eup %906 }
 0x3e2   :  { %v528_v43 = vsel %vm464_vm9, %v1341_v41, 0.0 }
 0x3e4   :  { %526 = vadd.xlane.f32.xlu2 %v525_v15 }
 0x3e9   :  { %529 = vadd.xlane.f32.xlu1 %v528_v43 }
 0x40e   :  { %v515_v44 = vpop.xlane.xlu0 %514 }
 0x40f   :  { %908 = vrcp.f32 %v515_v44  ;;  %v548_v49 = vand.u32 2147483648, %v515_v44  ;;  %vm542_vm1 = vweird.f32 %v515_v44  ;;  %v546_v33 = vand.u32 2147483647, %v515_v44 }
 0x411   :  { %v549_v21 = vor.u32 1.1754944e-38, %v548_v49  ;;  %vm547_vm4 = vcmp.eq.f32.partialorder %v546_v33, 8.507059e+37 }
 0x415   :  { %v909_v45 = vpop.eup %908 }
 0x416   :  { %v538_v23 = vmul.f32 %v909_v45, %v515_v44  ;;  %v518_v51 = vpop.xlane.xlu2 %517  ;;  %vm543_vm5 = vweird.f32 %v909_v45 }
 0x417   :  { %910 = vrcp.f32 %v518_v51  ;;  %vm544_vm3 = vmor %vm542_vm1, %vm543_vm5  ;;  %v563_v16 = vand.u32 2147483648, %v518_v51  ;;  %vm557_vm7 = vweird.f32 %v518_v51  ;;  %v561_v39 = vand.u32 2147483647, %v518_v51 }
 0x418   :  { %v539_v14 = vsub.f32 1.0, %v538_v23 }
 0x419   :  { %v564_v12 = vor.u32 1.1754944e-38, %v563_v16  ;;  %vm562_vm10 = vcmp.eq.f32.partialorder %v561_v39, 8.507059e+37 }
 0x41a   :  { %v540_v47 = vmul.f32 %v909_v45, %v539_v14 }
 0x41c   :  { %v541_v31 = vadd.f32 %v909_v45, %v540_v47 }
 0x41d   :  { %v911_v34 = vpop.eup %910 }
 0x41e   :  { %v553_v11 = vmul.f32 %v911_v34, %v518_v51  ;;  %v884_v50 = vpop.permute.xlu2 %883  ;;  %v545_v18 = vsel %vm544_vm3, %v909_v45, %v541_v31  ;;  %vm558_vm6 = vweird.f32 %v911_v34 }
 0x41f   :  { %v885_v52 = vunpack.i.l.bf16 %v884_v50  ;;  %v886_v29 = vunpack.i.h.bf16 %v884_v50  ;;  %v550_v54 = vsel %vm547_vm4, %v549_v21, %v545_v18  ;;  %vm559_vm8 = vmor %vm557_vm7, %vm558_vm6 }
 0x420   :  { %v554_v42 = vsub.f32 1.0, %v553_v11  ;;  %v551_v26 = vmul.f32 %v1304_v10, %v550_v54 }
 0x421   :  { %v889_v46 = vpop.permute.xlu0 %888  ;;  %717 = vmatpush.msra.mxu2 %v885_v52  ;;  %857 = vmatpush.msrb.mxu3 %v885_v52 }
 0x422   :  { %v555_v13 = vmul.f32 %v911_v34, %v554_v42  ;;  %v890_v53 = vunpack.i.l.bf16 %v889_v46  ;;  %v891_v20 = vunpack.i.h.bf16 %v889_v46 }
 0x423   :  { %718 = vmatpush.msra.mxu2 %v886_v29  ;;  %858 = vmatpush.msrb.mxu3 %v886_v29 }
 0x424   :  { %v556_v48 = vadd.f32 %v911_v34, %v555_v13 }
 0x425   :  { %719 = vmatpush.msra.mxu2 %v890_v53  ;;  %859 = vmatpush.msrb.mxu3 %v890_v53 }
 0x426   :  { %v560_v56 = vsel %vm559_vm8, %v911_v34, %v556_v48 }
 0x427   :  { %720 = vmatpush.msra.mxu2 %v891_v20  ;;  %860 = vmatpush.msrb.mxu3 %v891_v20  ;;  %v565_v60 = vsel %vm562_vm10, %v564_v12, %v560_v56 }
 0x428   :  { %v521_v24 = vpop.xlane.xlu1 %520  ;;  %835 = vmatmul.msk.f32.vlgmr.msra.gmra.mxu2 %vm464_vm9, %v551_v26  ;;  %v566_v9 = vmul.f32 %v1308_v55, %v565_v60 }
 0x429   :  { %912 = vrcp.f32 %v521_v24  ;;  %v578_v10 = vand.u32 2147483648, %v521_v24  ;;  %v576_v7 = vand.u32 2147483647, %v521_v24  ;;  %vm572_vm12 = vweird.f32 %v521_v24 }
 0x42b   :  { %v579_v3 = vor.u32 1.1754944e-38, %v578_v10  ;;  %vm577_vm14 = vcmp.eq.f32.partialorder %v576_v7, 8.507059e+37 }
 0x42f   :  { %v913_v61 = vpop.eup %912 }
 0x430   :  { %v568_v62 = vmul.f32 %v913_v61, %v521_v24  ;;  %836 = vmatmul.msk.f32.gmra.mxu2 %vm464_vm9, %v566_v9  ;;  %vm573_vm11 = vweird.f32 %v913_v61 }
 0x431   :  { %vm574_vm13 = vmor %vm572_vm12, %vm573_vm11 }
 0x432   :  { %v569_v36 = vsub.f32 1.0, %v568_v62 }
 0x434   :  { %v570_v17 = vmul.f32 %v913_v61, %v569_v36 }
 0x436   :  { %v571_v8 = vadd.f32 %v913_v61, %v570_v17 }
 0x438   :  { %v575_v63 = vsel %vm574_vm13, %v913_v61, %v571_v8 }
 0x439   :  { %v580_v0 = vsel %vm577_vm14, %v579_v3, %v575_v63 }
 0x43a   :  { %v581_v19 = vmul.f32 %v1315_v58, %v580_v0 }
 0x43c   :  { %837 = vmatmul.msk.f32.gmra.mxu2 %vm464_vm9, %v581_v19 }
 0x44c   :  { %v524_v55 = vpop.xlane.xlu0 %523 }
 0x44d   :  { %914 = vrcp.f32 %v524_v55  ;;  %v593_v28 = vand.u32 2147483648, %v524_v55  ;;  %v591_v30 = vand.u32 2147483647, %v524_v55  ;;  %vm587_vm5 = vweird.f32 %v524_v55 }
 0x44f   :  { %v594_v59 = vor.u32 1.1754944e-38, %v593_v28  ;;  %vm592_vm3 = vcmp.eq.f32.partialorder %v591_v30, 8.507059e+37 }
 0x453   :  { %v915_v22 = vpop.eup %914 }
 0x454   :  { %v583_v1 = vmul.f32 %v915_v22, %v524_v55  ;;  %v533_v2 = vpop.xlane.xlu1 %532  ;;  %v1351_v4 = vpop.xlane.xlu0 %535  ;;  %vm588_vm15 = vweird.f32 %v915_v22 }
 0x455   :  { %916 = vrcp.f32 %v533_v2  ;;  %vm589_vm1 = vmor %vm587_vm5, %vm588_vm15  ;;  %v636_v51 = vand.u32 2147483647, %v533_v2  ;;  %v638_v47 = vand.u32 2147483648, %v533_v2  ;;  %vm632_vm6 = vweird.f32 %v533_v2 }
 0x456   :  { %v584_v5 = vsub.f32 1.0, %v583_v1  ;;  %918 = vrcp.f32 %v1351_v4  ;;  %vm647_vm8 = vweird.f32 %v1351_v4  ;;  %v653_v54 = vand.u32 2147483648, %v1351_v4 }
 0x457   :  { %v527_v25 = vpop.xlane.xlu2 %526  ;;  %vm637_vm7 = vcmp.eq.f32.partialorder %v636_v51, 8.507059e+37  ;;  %v639_v21 = vor.u32 1.1754944e-38, %v638_v47  ;;  %v651_v24 = vand.u32 2147483647, %v1351_v4 }
 0x458   :  { %v585_v27 = vmul.f32 %v915_v22, %v584_v5  ;;  %920 = vrcp.f32 %v527_v25  ;;  %v608_v42 = vand.u32 2147483648, %v527_v25  ;;  %v606_v29 = vand.u32 2147483647, %v527_v25  ;;  %v780_v5 = vld [vmem:[%s1411_s3 + $0x10] sm:$0xff] }
 0x459   :  { %vm602_vm13 = vweird.f32 %v527_v25  ;;  %v654_v62 = vor.u32 1.1754944e-38, %v653_v54 }
 0x45a   :  { %v586_v58 = vadd.f32 %v915_v22, %v585_v27  ;;  %v609_v20 = vor.u32 1.1754944e-38, %v608_v42  ;;  %vm607_vm15 = vcmp.eq.f32.partialorder %v606_v29, 8.507059e+37  ;;  %v778_v27 = vld [vmem:[%s1411_s3] sm:$0xff] }
 0x45b   :  { %v917_v32 = vpop.eup %916 }
 0x45c   :  { %v1354_v35 = vpop.eup %918  ;;  %v628_v40 = vmul.f32 %v917_v32, %v533_v2  ;;  %v1356_v15 = vpop.xlane.xlu1 %529  ;;  %v590_v43 = vsel %vm589_vm1, %v915_v22, %v586_v58  ;;  %vm633_vm4 = vweird.f32 %v917_v32 }
 0x45d   :  { %v643_v44 = vmul.f32 %v1354_v35, %v1351_v4  ;;  %922 = vrcp.f32 %v1356_v15  ;;  %v595_v14 = vsel %vm592_vm3, %v594_v59, %v590_v43  ;;  %vm634_vm10 = vmor %vm632_vm6, %vm633_vm4  ;;  %vm648_vm12 = vweird.f32 %v1354_v35 }
 0x45e   :  { %v921_v45 = vpop.eup %920  ;;  %v629_v23 = vsub.f32 1.0, %v628_v40  ;;  %v596_v49 = vmul.f32 %v1324_v6, %v595_v14  ;;  %v623_v56 = vand.u32 2147483648, %v1356_v15  ;;  %vm649_vm5 = vmor %vm647_vm8, %vm648_vm12  ;;  %v621_v36 = vand.u32 2147483647, %v1356_v15 }
 0x45f   :  { %v644_v31 = vsub.f32 1.0, %v643_v44  ;;  %v598_v34 = vmul.f32 %v921_v45, %v527_v25  ;;  %vm603_vm11 = vweird.f32 %v921_v45  ;;  %vm617_vm3 = vweird.f32 %v1356_v15  ;;  %v779_v25 = vld [vmem:[%s1411_s3 + $0x8] sm:$0xff] }
 0x460   :  { %v630_v11 = vmul.f32 %v917_v32, %v629_v23  ;;  %838 = vmatmul.msk.f32.gmra.mxu2 %vm464_vm9, %v596_v49  ;;  %vm604_vm14 = vmor %vm602_vm13, %vm603_vm11  ;;  %vm652_vm4 = vcmp.eq.f32.partialorder %v651_v24, 8.507059e+37  ;;  %v624_v7 = vor.u32 1.1754944e-38, %v623_v56  ;;  %vm775_vm8 = vcmask 195584  }
 0x461   :  { %v645_v50 = vmul.f32 %v1354_v35, %v644_v31  ;;  %v599_v33 = vsub.f32 1.0, %v598_v34 }
 0x462   :  { %v631_v52 = vadd.f32 %v917_v32, %v630_v11 }
 0x463   :  { %v923_v18 = vpop.eup %922  ;;  %v600_v46 = vmul.f32 %v921_v45, %v599_v33  ;;  %v646_v53 = vadd.f32 %v1354_v35, %v645_v50 }
 0x464   :  { %v613_v6 = vmul.f32 %v923_v18, %v1356_v15  ;;  %v635_v13 = vsel %vm634_vm10, %v917_v32, %v631_v52  ;;  %vm618_vm1 = vweird.f32 %v923_v18 }
 0x465   :  { %v640_v48 = vsel %vm637_vm7, %v639_v21, %v635_v13  ;;  %v601_v16 = vadd.f32 %v921_v45, %v600_v46  ;;  %v650_v61 = vsel %vm649_vm5, %v1354_v35, %v646_v53  ;;  %vm619_vm6 = vmor %vm617_vm3, %vm618_vm1  ;;  %vm622_vm7 = vcmp.eq.f32.partialorder %v621_v36, 8.507059e+37 }
 0x466   :  { %v614_v26 = vsub.f32 1.0, %v613_v6  ;;  %v641_v39 = vmul.f32 %v1331_v37, %v640_v48  ;;  %v655_v17 = vsel %vm652_vm4, %v654_v62, %v650_v61 }
 0x467   :  { %v605_v12 = vsel %vm604_vm14, %v921_v45, %v601_v16  ;;  %v656_v3 = vmul.f32 %v1329_v57, %v655_v17 }
 0x468   :  { %v615_v60 = vmul.f32 %v923_v18, %v614_v26  ;;  %841 = vmatmul.msk.f32.vlgmr.msrb.gmra.mxu3 %vm464_vm9, %v641_v39  ;;  %v610_v9 = vsel %vm607_vm15, %v609_v20, %v605_v12 }
 0x469   :  { %v611_v37 = vmul.f32 %v1333_v38, %v610_v9 }
 0x46a   :  { %v616_v10 = vadd.f32 %v923_v18, %v615_v60 }
 0x46b   :  { %839 = vmatmul.msk.f32.gmra.mxu2 %vm464_vm9, %v611_v37 }
 0x46c   :  { %v620_v8 = vsel %vm619_vm6, %v923_v18, %v616_v10 }
 0x46d   :  { %v625_v63 = vsel %vm622_vm7, %v624_v7, %v620_v8 }
 0x46e   :  { %v626_v38 = vmul.f32 %v1341_v41, %v625_v63  ;;  %v781_v41 = vld [vmem:[%s1411_s3 + $0x18] sm:$0xff] }
 0x46f   :  { %800 = vmatpush.msra.mxu3 %v781_v41 }
 0x470   :  { %842 = vmatmul.msk.f32.gmra.mxu3 %vm464_vm9, %v656_v3 }
 0x471   :  { %801 = vmatpush.msra.mxu3 %v780_v5 }
 0x473   :  { %840 = vmatmul.msk.f32.gmra.mxu2 %vm464_vm9, %v626_v38  ;;  %802 = vmatpush.msra.mxu3 %v779_v25  ;;  %vm772_vm9 = vcmask 130048  }
 0x475   :  { %803 = vmatpush.msra.mxu3 %v778_v27 }
 0x4ab   :  { %v722_v0 = vpop.f32.mrf.mxu2 }
 0x4b3   :  { %v725_v19 = vpop.f32.mrf.mxu2 }
 0x4bf   :  { %v728_v55 = vpop.f32.mrf.mxu2 }
 0x4c0   :  { %748 = vrot.lane.b32.xlu2 %v728_v55, %s929_s20 }
 0x4e3   :  { %v731_v22 = vpop.f32.mrf.mxu2 }
 0x4e4   :  { %750 = vrot.lane.b32.xlu2 %v731_v22, %s929_s20 }
 0x4eb   :  { %v740_v1 = vpop.f32.mrf.mxu3 }
 0x4ec   :  { %764 = vrot.lane.b32.xlu0 %v740_v1, %s933_s23 }
 0x4ee   :  { %v734_v2 = vpop.f32.mrf.mxu2 }
 0x4ef   :  { %756 = vrot.lane.b32.xlu1 %v734_v2, %s934_s24 }
 0x4f3   :  { %v743_v57 = vpop.f32.mrf.mxu3 }
 0x4f6   :  { %v737_v4 = vpop.f32.mrf.mxu2 }
 0x4f7   :  { %766 = vrot.lane.b32.xlu1 %v743_v57, %s933_s23  ;;  %758 = vrot.lane.b32.xlu0 %v737_v4, %s934_s24 }
 0x51a   :  { %v749_v28 = vpop.permute.xlu2 %748 }
 0x51b   :  { %v770_v30 = vsel %vm330_vm2, %v722_v0, %v749_v28 }
 0x53e   :  { %v751_v40 = vpop.permute.xlu2 %750 }
 0x53f   :  { %v771_v15 = vsel %vm330_vm2, %v725_v19, %v751_v40 }
 0x55e   :  { %v765_v58 = vpop.permute.xlu0 %764 }
 0x561   :  { %v757_v32 = vpop.permute.xlu1 %756 }
 0x562   :  { %v773_v35 = vsel %vm772_vm9, %v770_v30, %v757_v32 }
 0x563   :  { %v776_v59 = vsel %vm775_vm8, %v773_v35, %v765_v58 }
 0x564   :  { %843 = vmatmul.msk.f32.vlgmr.msra.gmra.mxu3 %vm23_vm0, %v776_v59 }
 0x569   :  { %v767_v43 = vpop.permute.xlu1 %766  ;;  %v759_v44 = vpop.permute.xlu0 %758 }
 0x56a   :  { %v774_v45 = vsel %vm772_vm9, %v771_v15, %v759_v44 }
 0x56b   :  { %v777_v23 = vsel %vm775_vm8, %v774_v45, %v767_v43 }
 0x56c   :  { %844 = vmatmul.msk.f32.gmra.mxu3 %vm23_vm0, %v777_v23 }
 0x5e7   :  { %v805_v51 = vpop.f32.mrf.mxu3 }
 0x5e8   :  { %811 = vst [vmem:[%s1412_s4] sm:$0xff] %v805_v51 }
 0x5ef   :  { %v808_v14 = vpop.f32.mrf.mxu3 }
 0x5f0   :  { %812 = vst [vmem:[%s1412_s4 + $0x8] sm:$0xff] %v808_v14 }

</bundles_post_ra>
